<compile_context>
chip_gen: v5e
topology: v5e:2x2
jax: 0.10.0
libtpu: 0.0.40
codegen_flags: <defaults>
</compile_context>

<pallas_src>
from enum import Enum

import numpy as np
import jax
import jax.numpy as jnp
from jax.experimental import pallas as pl
from jax.experimental.pallas import tpu as pltpu


def _round_up(x, m):
    return ((int(x) + m - 1) // m) * m


# ----------------------------- fused Pallas kernel ---------------------------

def _fused_kernel(x_ref, w1_ref, b1_ref, w2_ref, b2_ref, w3_ref, b3_ref,
                  colsel_ref, rowmask_ref, bmat_ref, o_ref):
    # Block-diagonal 3-layer MLP: every node-factor and edge-factor network
    # evaluated in one matmul chain (rows of x = factor terms).
    h = jnp.dot(x_ref[...], w1_ref[...], preferred_element_type=jnp.float32) + b1_ref[...]
    h = jnp.maximum(h, 0.0)
    h = jnp.dot(h, w2_ref[...], preferred_element_type=jnp.float32) + b2_ref[...]
    h = jnp.maximum(h, 0.0)
    y = jnp.dot(h, w3_ref[...], preferred_element_type=jnp.float32) + b3_ref[...]
    # Gather each term's output block (z or z*z values) into one packed row;
    # intermediates stay in VMEM/vregs.
    ysel = jnp.dot(y, colsel_ref[...], preferred_element_type=jnp.float32)     # (B_pad, T_pad)
    packed = jnp.sum(ysel * rowmask_ref[...], axis=0, keepdims=True)           # (1, T_pad)
    # Broadcast-sum of all factors into the flattened, lane-dense Gibbs table.
    o_ref[...] = jnp.dot(packed, bmat_ref[...], preferred_element_type=jnp.float32)


def clique_gibbs_fused(x, packed_params, colsel, rowmask, bmat, table_size):
    """Single pallas_call computing the whole clique Gibbs table (flattened)."""
    w1, b1, w2, b2, w3, b3 = packed_params
    vmem = pl.BlockSpec(memory_space=pltpu.MemorySpace.VMEM)
    # TODO(synk): for very large cliques (z**N * 4 bytes approaching the per-chip
    # VMEM budget, e.g. N >= ~10 on v7x) this should tile the flat table with a
    # grid of lane-dense (8,128) blocks instead of a single invocation.
    return pl.pallas_call(
        _fused_kernel,
        out_shape=jax.ShapeDtypeStruct((1, table_size), jnp.float32),
        in_specs=[vmem] * 10,
        out_specs=vmem,
    )(x, w1, b1, w2, b2, w3, b3, colsel, rowmask, bmat)


# ------------------------ parameter init (deterministic) --------------------

def _init_mlp(key, in_dim, hidden, out_dim):
    dims = [in_dim] + list(hidden) + [out_dim]
    ks = jax.random.split(key, 2 * (len(dims) - 1))
    params = []
    for l in range(len(dims) - 1):
        bound = 1.0 / np.sqrt(dims[l])
        w = jax.random.uniform(ks[2 * l], (dims[l], dims[l + 1]),
                               jnp.float32, -bound, bound)
        b = jax.random.uniform(ks[2 * l + 1], (1, dims[l + 1]),
                               jnp.float32, -bound, bound)
        params.extend([w, b])
    return tuple(params)


# ------------------------------- the module ---------------------------------

class CliqueGibbsDistr:
    def __init__(self, state_enc_dim, edge_encoding_dim, z_dim, edge_types,
                 node_types, node_hidden_dim=(64, 64), edge_hidden_dim=(64, 64),
                 seed=0):
        self.z_dim = z_dim
        self.edge_types = list(edge_types)
        self.node_types = list(node_types)
        self.et_name = {et: et[0].name + '->' + et[1].name for et in self.edge_types}

        key = jax.random.PRNGKey(seed)
        self.node_factor = {}
        self.edge_factor = {}
        specs = []  # (name, in_dim, h1, h2, out_dim, params)
        for nt in self.node_types:
            key, sub = jax.random.split(key)
            p = _init_mlp(sub, state_enc_dim[nt], node_hidden_dim, z_dim)
            self.node_factor[nt.name] = p
            specs.append((nt.name, state_enc_dim[nt], node_hidden_dim[0],
                          node_hidden_dim[1], z_dim, p))
        for et in self.edge_types:
            key, sub = jax.random.split(key)
            name = self.et_name[et]
            p = _init_mlp(sub, edge_encoding_dim[et], edge_hidden_dim, z_dim * z_dim)
            self.edge_factor[name] = p
            specs.append((name, edge_encoding_dim[et], edge_hidden_dim[0],
                          edge_hidden_dim[1], z_dim * z_dim, p))

        # --- block-diagonal packing of every factor MLP into one weight set ---
        d_off = h1_off = h2_off = o_off = 0
        self.layout = {}
        for name, din, h1, h2, dout, _ in specs:
            self.layout[name] = dict(in_off=d_off, in_dim=din,
                                     out_off=o_off, out_dim=dout)
            d_off += din; h1_off += h1; h2_off += h2; o_off += dout
        self.D_pad = _round_up(d_off, 128)
        self.H1_pad = _round_up(h1_off, 128)
        self.H2_pad = _round_up(h2_off, 128)
        self.O_pad = _round_up(o_off, 128)

        W1 = np.zeros((self.D_pad, self.H1_pad), np.float32)
        B1 = np.zeros((1, self.H1_pad), np.float32)
        W2 = np.zeros((self.H1_pad, self.H2_pad), np.float32)
        B2 = np.zeros((1, self.H2_pad), np.float32)
        W3 = np.zeros((self.H2_pad, self.O_pad), np.float32)
        B3 = np.zeros((1, self.O_pad), np.float32)
        d_off = h1_off = h2_off = o_off = 0
        for name, din, h1, h2, dout, p in specs:
            w1, b1, w2, b2, w3, b3 = (np.asarray(a) for a in p)
            W1[d_off:d_off + din, h1_off:h1_off + h1] = w1
            B1[0, h1_off:h1_off + h1] = b1[0]
            W2[h1_off:h1_off + h1, h2_off:h2_off + h2] = w2
            B2[0, h2_off:h2_off + h2] = b2[0]
            W3[h2_off:h2_off + h2, o_off:o_off + dout] = w3
            B3[0, o_off:o_off + dout] = b3[0]
            d_off += din; h1_off += h1; h2_off += h2; o_off += dout
        self.packed = tuple(jnp.asarray(a) for a in (W1, B1, W2, B2, W3, B3))

    def __call__(self, node_types, node_encs, edge_encoding, clique_is_robot=None):
        z = self.z_dim
        if clique_is_robot is None:
            keep = [True] * len(node_types)
        else:
            keep = [not r for r in clique_is_robot]
        N = int(sum(keep))
        if N == 0:
            return jnp.array([1.0], jnp.float32)
        adjusted_idx = list(np.cumsum([0] + [int(k) for k in keep[:-1]]))

        # --- enumerate factor terms (one MLP "row" per term): static glue ----
        rows = []  # (mlp_name, encoding, clique axis/axes)
        for i, nt in enumerate(node_types):
            if keep[i]:
                rows.append((nt.name, node_encs[i], (adjusted_idx[i],)))
        for (i, j), enc in edge_encoding.items():
            if keep[i] and keep[j] and (node_types[i], node_types[j]) in self.edge_types:
                name = node_types[i].name + '->' + node_types[j].name
                rows.append((name, enc, (adjusted_idx[i], adjusted_idx[j])))

        B = len(rows)
        B_pad = _round_up(B, 8)
        F = z ** N                                        # flat Gibbs table size
        lens = [z if len(pos) == 1 else z * z for _, _, pos in rows]
        T = int(sum(lens))
        T_pad = _round_up(T, 128)

        # --- host-built (numpy) constant gather / broadcast matrices ---------
        colsel = np.zeros((self.O_pad, T_pad), np.float32)   # MLP-out cols -> packed terms
        rowmask = np.zeros((B_pad, T_pad), np.float32)       # MLP-out rows -> packed terms
        bmat = np.zeros((T_pad, F), np.float32)              # packed terms  -> flat table
        f = np.arange(F)
        u = 0
        for r, (name, _, pos) in enumerate(rows):
            lay = self.layout[name]
            L = lens[r]
            colsel[lay['out_off']:lay['out_off'] + L, u:u + L] = np.eye(L, dtype=np.float32)
            rowmask[r, u:u + L] = 1.0
            if len(pos) == 1:                                  # node factor
                a = (f // (z ** (N - 1 - pos[0]))) % z
                for k in range(z):
                    bmat[u + k, :] = (a == k)
            else:                                              # edge factor: torch .view(dim)
                pmin, pmax = min(pos), max(pos)
                amin = (f // (z ** (N - 1 - pmin))) % z
                amax = (f // (z ** (N - 1 - pmax))) % z
                for m in range(z * z):
                    bmat[u + m, :] = (amin == m // z) & (amax == m % z)
            u += L

        # --- packed kernel input: one zero-padded row per factor term --------
        xs = []
        for name, enc, _ in rows:
            lay = self.layout[name]
            v = jnp.asarray(enc, jnp.float32)
            xs.append(jnp.pad(v, (lay['in_off'],
                                  self.D_pad - lay['in_off'] - lay['in_dim'])))
        x = jnp.stack(xs, axis=0)
        if B_pad > B:
            x = jnp.pad(x, ((0, B_pad - B), (0, 0)))

        flat = clique_gibbs_fused(x, self.packed,
                                  jnp.asarray(colsel), jnp.asarray(rowmask),
                                  jnp.asarray(bmat), F)
        return flat.reshape((z,) * N)


# ----------------------------- pure-JAX reference ----------------------------

def _mlp_ref(x, params):
    w1, b1, w2, b2, w3, b3 = params
    hp = jax.lax.Precision.HIGHEST
    h = jnp.maximum(jnp.dot(x, w1, precision=hp) + b1, 0.0)
    h = jnp.maximum(jnp.dot(h, w2, precision=hp) + b2, 0.0)
    return jnp.dot(h, w3, precision=hp) + b3


def reference_forward(model, node_types, node_encs, edge_encoding, clique_is_robot=None):
    z = model.z_dim
    keep = [True] * len(node_types) if clique_is_robot is None else [not r for r in clique_is_robot]
    N = int(sum(keep))
    if N == 0:
        return jnp.array([1.0], jnp.float32)
    adjusted_idx = list(np.cumsum([0] + [int(k) for k in keep[:-1]]))
    res = jnp.zeros((z,) * N, jnp.float32)
    for i in range(len(node_types)):
        if keep[i]:
            fac = _mlp_ref(node_encs[i][None, :], model.node_factor[node_types[i].name])[0]
            dim = [1] * N
            dim[adjusted_idx[i]] = z
            res = res + fac.reshape(dim)
    for (i, j), enc in edge_encoding.items():
        if keep[i] and keep[j] and (node_types[i], node_types[j]) in model.edge_types:
            name = node_types[i].name + '->' + node_types[j].name
            fac = _mlp_ref(enc[None, :], model.edge_factor[name])[0]
            dim = [1] * N
            dim[adjusted_idx[i]] = z
            dim[adjusted_idx[j]] = z
            res = res + fac.reshape(dim)
    return res


# ------------------------------------ main -----------------------------------

if __name__ == "__main__":
    class NodeType(Enum):
        PEDESTRIAN = 0
        VEHICLE = 1

    PED, VEH = NodeType.PEDESTRIAN, NodeType.VEHICLE
    z_dim = 4
    state_enc_dim = {PED: 32, VEH: 48}
    edge_types = [(PED, PED), (PED, VEH), (VEH, PED)]
    edge_encoding_dim = {(PED, PED): 24, (PED, VEH): 40, (VEH, PED): 40}

    model = CliqueGibbsDistr(state_enc_dim, edge_encoding_dim, z_dim,
                             edge_types, [PED, VEH], seed=0)

    key = jax.random.PRNGKey(0)
    k1, k2, k3, k4, k5, k6 = jax.random.split(key, 6)
    node_types = [PED, VEH, PED]
    node_encs = [jax.random.normal(k1, (32,), jnp.float32),
                 jax.random.normal(k2, (48,), jnp.float32),
                 jax.random.normal(k3, (32,), jnp.float32)]
    edge_encoding = {
        (0, 1): jax.random.normal(k4, (40,), jnp.float32),   # PED->VEH
        (1, 2): jax.random.normal(k5, (40,), jnp.float32),   # VEH->PED
        (0, 2): jax.random.normal(k6, (24,), jnp.float32),   # PED->PED
    }

    out = jax.block_until_ready(model(node_types, node_encs, edge_encoding))
    ref = reference_forward(model, node_types, node_encs, edge_encoding)
    assert out.shape == (z_dim,) * 3, out.shape
    assert np.allclose(np.asarray(out), np.asarray(ref), rtol=1e-3, atol=1e-3), \
        float(np.max(np.abs(np.asarray(out) - np.asarray(ref))))

    # robot-masked path (index bookkeeping is static glue; same fused kernel)
    cir = [False, True, False]
    out_r = jax.block_until_ready(
        model(node_types, node_encs, edge_encoding, clique_is_robot=cir))
    ref_r = reference_forward(model, node_types, node_encs, edge_encoding,
                              clique_is_robot=cir)
    assert out_r.shape == (z_dim, z_dim), out_r.shape
    assert np.allclose(np.asarray(out_r), np.asarray(ref_r), rtol=1e-3, atol=1e-3), \
        float(np.max(np.abs(np.asarray(out_r) - np.asarray(ref_r))))

    print("KERNEL_OK")
</pallas_src>

<mosaic_0001>
module attributes {stable_mosaic.version = 11 : i64} {
  func.func @_fused_kernel(%arg0: memref<8x256xf32, #tpu.memory_space<vmem>>, %arg1: memref<256x384xf32, #tpu.memory_space<vmem>>, %arg2: memref<1x384xf32, #tpu.memory_space<vmem>>, %arg3: memref<384x384xf32, #tpu.memory_space<vmem>>, %arg4: memref<1x384xf32, #tpu.memory_space<vmem>>, %arg5: memref<384x128xf32, #tpu.memory_space<vmem>>, %arg6: memref<1x128xf32, #tpu.memory_space<vmem>>, %arg7: memref<128x128xf32, #tpu.memory_space<vmem>>, %arg8: memref<8x128xf32, #tpu.memory_space<vmem>>, %arg9: memref<128x64xf32, #tpu.memory_space<vmem>>, %arg10: memref<1x64xf32, #tpu.memory_space<vmem>>) attributes {dimension_semantics = [], scalar_prefetch = 0 : i64, scratch_operands = 0 : i64, tpu.core_type = #tpu.core_type<tc>} {
    %c0 = arith.constant 0 : index
    %c0_0 = arith.constant 0 : index
    %0 = vector.load %arg0[%c0, %c0_0] : memref<8x256xf32, #tpu.memory_space<vmem>>, vector<8x256xf32>
    %c0_1 = arith.constant 0 : index
    %c0_2 = arith.constant 0 : index
    %1 = vector.load %arg1[%c0_1, %c0_2] : memref<256x384xf32, #tpu.memory_space<vmem>>, vector<256x384xf32>
    %cst = arith.constant dense<0.000000e+00> : vector<8x384xf32>
    %2 = tpu.matmul %0, %1, %cst {dimension_numbers = #tpu.dot_dimension_numbers<[1], [0], [0], [1], [0, 0, 1, 1], [], []>} : vector<8x256xf32>, vector<256x384xf32>, vector<8x384xf32> -> vector<8x384xf32>
    %c0_3 = arith.constant 0 : index
    %c0_4 = arith.constant 0 : index
    %3 = vector.load %arg2[%c0_3, %c0_4] : memref<1x384xf32, #tpu.memory_space<vmem>>, vector<1x384xf32>
    %4 = vector.broadcast %3 : vector<1x384xf32> to vector<8x384xf32>
    %5 = arith.addf %2, %4 : vector<8x384xf32>
    %cst_5 = arith.constant 0.000000e+00 : f32
    %6 = vector.broadcast %cst_5 : f32 to vector<8x384xf32>
    %7 = arith.maximumf %5, %6 : vector<8x384xf32>
    %c0_6 = arith.constant 0 : index
    %c0_7 = arith.constant 0 : index
    %8 = vector.load %arg3[%c0_6, %c0_7] : memref<384x384xf32, #tpu.memory_space<vmem>>, vector<384x384xf32>
    %cst_8 = arith.constant dense<0.000000e+00> : vector<8x384xf32>
    %9 = tpu.matmul %7, %8, %cst_8 {dimension_numbers = #tpu.dot_dimension_numbers<[1], [0], [0], [1], [0, 0, 1, 1], [], []>} : vector<8x384xf32>, vector<384x384xf32>, vector<8x384xf32> -> vector<8x384xf32>
    %c0_9 = arith.constant 0 : index
    %c0_10 = arith.constant 0 : index
    %10 = vector.load %arg4[%c0_9, %c0_10] : memref<1x384xf32, #tpu.memory_space<vmem>>, vector<1x384xf32>
    %11 = vector.broadcast %10 : vector<1x384xf32> to vector<8x384xf32>
    %12 = arith.addf %9, %11 : vector<8x384xf32>
    %cst_11 = arith.constant 0.000000e+00 : f32
    %13 = vector.broadcast %cst_11 : f32 to vector<8x384xf32>
    %14 = arith.maximumf %12, %13 : vector<8x384xf32>
    %c0_12 = arith.constant 0 : index
    %c0_13 = arith.constant 0 : index
    %15 = vector.load %arg5[%c0_12, %c0_13] : memref<384x128xf32, #tpu.memory_space<vmem>>, vector<384x128xf32>
    %cst_14 = arith.constant dense<0.000000e+00> : vector<8x128xf32>
    %16 = tpu.matmul %14, %15, %cst_14 {dimension_numbers = #tpu.dot_dimension_numbers<[1], [0], [0], [1], [0, 0, 1, 1], [], []>} : vector<8x384xf32>, vector<384x128xf32>, vector<8x128xf32> -> vector<8x128xf32>
    %c0_15 = arith.constant 0 : index
    %c0_16 = arith.constant 0 : index
    %17 = vector.load %arg6[%c0_15, %c0_16] : memref<1x128xf32, #tpu.memory_space<vmem>>, vector<1x128xf32>
    %18 = vector.broadcast %17 : vector<1x128xf32> to vector<8x128xf32>
    %19 = arith.addf %16, %18 : vector<8x128xf32>
    %c0_17 = arith.constant 0 : index
    %c0_18 = arith.constant 0 : index
    %20 = vector.load %arg7[%c0_17, %c0_18] : memref<128x128xf32, #tpu.memory_space<vmem>>, vector<128x128xf32>
    %cst_19 = arith.constant dense<0.000000e+00> : vector<8x128xf32>
    %21 = tpu.matmul %19, %20, %cst_19 {dimension_numbers = #tpu.dot_dimension_numbers<[1], [0], [0], [1], [0, 0, 1, 1], [], []>} : vector<8x128xf32>, vector<128x128xf32>, vector<8x128xf32> -> vector<8x128xf32>
    %c0_20 = arith.constant 0 : index
    %c0_21 = arith.constant 0 : index
    %22 = vector.load %arg8[%c0_20, %c0_21] : memref<8x128xf32, #tpu.memory_space<vmem>>, vector<8x128xf32>
    %23 = arith.mulf %21, %22 : vector<8x128xf32>
    %cst_22 = arith.constant dense<0.000000e+00> : vector<128xf32>
    %24 = vector.multi_reduction <add>, %23, %cst_22 [0] : vector<8x128xf32> to vector<128xf32>
    %25 = vector.shape_cast %24 : vector<128xf32> to vector<1x128xf32>
    %c0_23 = arith.constant 0 : index
    %c0_24 = arith.constant 0 : index
    %26 = vector.load %arg9[%c0_23, %c0_24] : memref<128x64xf32, #tpu.memory_space<vmem>>, vector<128x64xf32>
    %cst_25 = arith.constant dense<0.000000e+00> : vector<1x64xf32>
    %27 = tpu.matmul %25, %26, %cst_25 {dimension_numbers = #tpu.dot_dimension_numbers<[1], [0], [0], [1], [0, 0, 1, 1], [], []>} : vector<1x128xf32>, vector<128x64xf32>, vector<1x64xf32> -> vector<1x64xf32>
    %c0_26 = arith.constant 0 : index
    %c0_27 = arith.constant 0 : index
    %28 = vector.load %arg10[%c0_26, %c0_27] : memref<1x64xf32, #tpu.memory_space<vmem>>, vector<1x64xf32>
    tpu.vector_store %arg10[%c0_26, %c0_27], %27 {strides = array<i32>} : memref<1x64xf32, #tpu.memory_space<vmem>>, vector<1x64xf32>,
    return
  }
}

</mosaic_0001>

<bundles_post_ra>
// kernel: tpu_custom_call.1
= control target key start
LH: loop header
LB: loop body
LE: loop exit
PB: predicated region body
PF: predicated region fallthrough
CT: control target
= control target key end

     0   :  { %15 = vsyncpa [#allocation3], 0  ;;  %s1179_s0 = inlined_call_operand.vmem [shape: f32[8,256], index: 0, kind: input, shape index: {}]   ;;  %s1180_s1 = inlined_call_operand.hbm [shape: f32[256,384], index: 1, kind: input, shape index: {}]   ;;  %s1181_s2 = inlined_call_operand.vmem [shape: f32[1,384], index: 2, kind: input, shape index: {}]   ;;  %s1182_s3 = inlined_call_operand.hbm [shape: f32[384,384], index: 3, kind: input, shape index: {}]   ;;  %s1183_s4 = inlined_call_operand.vmem [shape: f32[1,384], index: 4, kind: input, shape index: {}]   ;;  %s1184_s5 = inlined_call_operand.hbm [shape: f32[384,128], index: 5, kind: input, shape index: {}]   ;;  %s1185_s6 = inlined_call_operand.vmem [shape: f32[1,128], index: 6, kind: input, shape index: {}]   ;;  %s1186_s7 = inlined_call_operand.vmem [shape: f32[128,128], index: 7, kind: input, shape index: {}]   ;;  %s1187_s8 = inlined_call_operand.vmem [shape: f32[8,128], index: 8, kind: input, shape index: {}]   ;;  %s1188_s9 = inlined_call_operand.vmem [shape: f32[128,64], index: 9, kind: input, shape index: {}]   ;;  %s1189_s10 = inlined_call_operand.hbm [shape: f32[1,64], index: 10, kind: output, shape index: {}]  }
   0x1   :  { %16 = vsyncpa [#allocation6], 0 }
   0x2   :  { %17 = vsyncpa [#allocation4], 0  ;;  %s39_s15 = sshll.u32 %s1182_s3, 4  ;;  %s970_s16 = smov [#allocation5]   ;;  %s40_s15 = int_to_ptr.hbm [resolvable:$true] %s39_s15 }
   0x3   :  { %s41_s17 = sshll.u32 %s970_s16, 4  ;;  %s24_s20 = sshll.u32 %s1180_s1, 4  ;;  %s42_s17 = int_to_ptr.vmem [resolvable:$true] %s41_s17  ;;  %s25_s20 = int_to_ptr.hbm [resolvable:$true] %s24_s20 }
   0x4   :  { %s971_s21 = smov 384   ;;  %s972_s22 = smov 24  }
   0x5   :  { %47 = dma.hbm_to_vmem [thread:$0]  %s40_s15, 18432, %s42_s17, [#allocation6], %s971_s21, %s971_s21, %s972_s22  }
   0x6   :  { %s973_s23 = smov [#allocation2]   ;;  %s54_s27 = sshll.u32 %s1184_s5, 4  ;;  %s55_s27 = int_to_ptr.hbm [resolvable:$true] %s54_s27 }
   0x7   :  { %s26_s24 = sshll.u32 %s973_s23, 4  ;;  %s974_s3 = smov [#allocation7]   ;;  %s27_s24 = int_to_ptr.vmem [resolvable:$true] %s26_s24 }
   0x8   :  { %32 = dma.hbm_to_vmem [thread:$0]  %s25_s20, 12288, %s27_s24, [#allocation3], %s971_s21, %s971_s21, %s972_s22  }
   0x9   :  { %s56_s28 = sshll.u32 %s974_s3, 4  ;;  %s975_s29 = smov 128   ;;  %s57_s28 = int_to_ptr.vmem [resolvable:$true] %s56_s28 }
   0xa   :  { %s976_s30 = smov 8  }
   0xb   :  { %62 = dma.hbm_to_vmem [thread:$0]  %s55_s27, 6144, %s57_s28, [#allocation6], %s975_s29, %s975_s29, %s976_s30  }
   0xc   :  { %964 = dma.done.wait [#allocation3], 12288  }
   0xd   :  { %965 = vsyncadd [#allocation3], 4294955008 }
   0xe   :  { %966 = dma.done.wait [#allocation6], 24576  }
   0xf   :  { %967 = vsyncadd [#allocation6], 4294942720  ;;  %v130_v0 = vld [vmem:[#allocation2 + $0x168] sm:$0xff]  ;;  %v127_v1 = vld [vmem:[#allocation2 + $0x150] sm:$0xff]  ;;  %vm839_vm0 = vcmask 516096  }
  0x10   :  { %v178_v2 = vld [vmem:[#allocation2 + $0x2e8] sm:$0xff]  ;;  %189 = vmatpush.msra.mxu0 %v130_v0  ;;  %v131_v3 = vld [vmem:[#allocation2 + $0x170] sm:$0xff]  ;;  %v124_v5 = vld [vmem:[#allocation2 + $0x138] sm:$0xff] }
  0x11   :  { %209 = vmatpush.msra.mxu1 %v178_v2  ;;  %v175_v4 = vld [vmem:[#allocation2 + $0x2d0] sm:$0xff]  ;;  %229 = vmatpush.msra.mxu2 %v131_v3  ;;  %v128_v6 = vld [vmem:[#allocation2 + $0x158] sm:$0xff]  ;;  %v125_v9 = vld [vmem:[#allocation2 + $0x140] sm:$0xff] }
  0x12   :  { %v179_v7 = vld [vmem:[#allocation2 + $0x2f0] sm:$0xff]  ;;  %190 = vmatpush.msra.mxu0 %v127_v1  ;;  %v172_v8 = vld [vmem:[#allocation2 + $0x2b8] sm:$0xff]  ;;  %v121_v11 = vld [vmem:[#allocation2 + $0x120] sm:$0xff] }
  0x13   :  { %210 = vmatpush.msra.mxu1 %v175_v4  ;;  %v176_v10 = vld [vmem:[#allocation2 + $0x2d8] sm:$0xff]  ;;  %230 = vmatpush.msra.mxu2 %v128_v6  ;;  %v169_v12 = vld [vmem:[#allocation2 + $0x2a0] sm:$0xff]  ;;  %v122_v13 = vld [vmem:[#allocation2 + $0x128] sm:$0xff] }
  0x14   :  { %249 = vmatpush.msra.mxu3 %v179_v7  ;;  %191 = vmatpush.msra.mxu0 %v124_v5  ;;  %v173_v14 = vld [vmem:[#allocation2 + $0x2c0] sm:$0xff]  ;;  %v118_v15 = vld [vmem:[#allocation2 + $0x108] sm:$0xff]  ;;  %v119_v17 = vld [vmem:[#allocation2 + $0x110] sm:$0xff] }
  0x15   :  { %211 = vmatpush.msra.mxu1 %v172_v8  ;;  %231 = vmatpush.msra.mxu2 %v125_v9  ;;  %v166_v16 = vld [vmem:[#allocation2 + $0x288] sm:$0xff]  ;;  %v115_v19 = vld [vmem:[#allocation2 + $0xf0] sm:$0xff]  ;;  %v116_v21 = vld [vmem:[#allocation2 + $0xf8] sm:$0xff] }
  0x16   :  { %250 = vmatpush.msra.mxu3 %v176_v10  ;;  %192 = vmatpush.msra.mxu0 %v121_v11  ;;  %v170_v18 = vld [vmem:[#allocation2 + $0x2a8] sm:$0xff]  ;;  %v163_v20 = vld [vmem:[#allocation2 + $0x270] sm:$0xff]  ;;  %v112_v23 = vld [vmem:[#allocation2 + $0xd8] sm:$0xff] }
  0x17   :  { %212 = vmatpush.msra.mxu1 %v169_v12  ;;  %232 = vmatpush.msra.mxu2 %v122_v13  ;;  %v167_v22 = vld [vmem:[#allocation2 + $0x290] sm:$0xff]  ;;  %v160_v24 = vld [vmem:[#allocation2 + $0x258] sm:$0xff]  ;;  %v113_v25 = vld [vmem:[#allocation2 + $0xe0] sm:$0xff] }
  0x18   :  { %251 = vmatpush.msra.mxu3 %v173_v14  ;;  %193 = vmatpush.msra.mxu0 %v118_v15  ;;  %v164_v26 = vld [vmem:[#allocation2 + $0x278] sm:$0xff]  ;;  %v109_v27 = vld [vmem:[#allocation2 + $0xc0] sm:$0xff]  ;;  %v110_v29 = vld [vmem:[#allocation2 + $0xc8] sm:$0xff] }
  0x19   :  { %213 = vmatpush.msra.mxu1 %v166_v16  ;;  %233 = vmatpush.msra.mxu2 %v119_v17  ;;  %v157_v28 = vld [vmem:[#allocation2 + $0x240] sm:$0xff]  ;;  %v106_v31 = vld [vmem:[#allocation2 + $0xa8] sm:$0xff]  ;;  %v107_v33 = vld [vmem:[#allocation2 + $0xb0] sm:$0xff] }
  0x1a   :  { %252 = vmatpush.msra.mxu3 %v170_v18  ;;  %194 = vmatpush.msra.mxu0 %v115_v19  ;;  %v161_v30 = vld [vmem:[#allocation2 + $0x260] sm:$0xff]  ;;  %v154_v32 = vld [vmem:[#allocation2 + $0x228] sm:$0xff]  ;;  %v103_v35 = vld [vmem:[#allocation2 + $0x90] sm:$0xff] }
  0x1b   :  { %214 = vmatpush.msra.mxu1 %v163_v20  ;;  %234 = vmatpush.msra.mxu2 %v116_v21  ;;  %v158_v34 = vld [vmem:[#allocation2 + $0x248] sm:$0xff]  ;;  %v151_v36 = vld [vmem:[#allocation2 + $0x210] sm:$0xff]  ;;  %v104_v37 = vld [vmem:[#allocation2 + $0x98] sm:$0xff] }
  0x1c   :  { %253 = vmatpush.msra.mxu3 %v167_v22  ;;  %195 = vmatpush.msra.mxu0 %v112_v23  ;;  %v155_v38 = vld [vmem:[#allocation2 + $0x230] sm:$0xff]  ;;  %v100_v39 = vld [vmem:[#allocation2 + $0x78] sm:$0xff]  ;;  %v101_v41 = vld [vmem:[#allocation2 + $0x80] sm:$0xff] }
  0x1d   :  { %215 = vmatpush.msra.mxu1 %v160_v24  ;;  %235 = vmatpush.msra.mxu2 %v113_v25  ;;  %v148_v40 = vld [vmem:[#allocation2 + $0x1f8] sm:$0xff]  ;;  %v97_v43 = vld [vmem:[#allocation2 + $0x60] sm:$0xff]  ;;  %v98_v45 = vld [vmem:[#allocation2 + $0x68] sm:$0xff] }
  0x1e   :  { %254 = vmatpush.msra.mxu3 %v164_v26  ;;  %196 = vmatpush.msra.mxu0 %v109_v27  ;;  %v152_v42 = vld [vmem:[#allocation2 + $0x218] sm:$0xff]  ;;  %v145_v44 = vld [vmem:[#allocation2 + $0x1e0] sm:$0xff]  ;;  %v94_v47 = vld [vmem:[#allocation2 + $0x48] sm:$0xff] }
  0x1f   :  { %216 = vmatpush.msra.mxu1 %v157_v28  ;;  %236 = vmatpush.msra.mxu2 %v110_v29  ;;  %v149_v46 = vld [vmem:[#allocation2 + $0x200] sm:$0xff]  ;;  %v142_v48 = vld [vmem:[#allocation2 + $0x1c8] sm:$0xff]  ;;  %v95_v49 = vld [vmem:[#allocation2 + $0x50] sm:$0xff] }
  0x20   :  { %255 = vmatpush.msra.mxu3 %v161_v30  ;;  %197 = vmatpush.msra.mxu0 %v106_v31  ;;  %v146_v50 = vld [vmem:[#allocation2 + $0x1e8] sm:$0xff]  ;;  %v91_v51 = vld [vmem:[#allocation2 + $0x30] sm:$0xff]  ;;  %v92_v53 = vld [vmem:[#allocation2 + $0x38] sm:$0xff] }
  0x21   :  { %217 = vmatpush.msra.mxu1 %v154_v32  ;;  %237 = vmatpush.msra.mxu2 %v107_v33  ;;  %v139_v52 = vld [vmem:[#allocation2 + $0x1b0] sm:$0xff]  ;;  %v88_v55 = vld [vmem:[#allocation2 + $0x18] sm:$0xff]  ;;  %v89_v57 = vld [vmem:[#allocation2 + $0x20] sm:$0xff] }
  0x22   :  { %256 = vmatpush.msra.mxu3 %v158_v34  ;;  %198 = vmatpush.msra.mxu0 %v103_v35  ;;  %v143_v54 = vld [vmem:[#allocation2 + $0x1d0] sm:$0xff]  ;;  %v136_v56 = vld [vmem:[#allocation2 + $0x198] sm:$0xff]  ;;  %v85_v59 = vld [vmem:[#allocation2] sm:$0xff] }
  0x23   :  { %218 = vmatpush.msra.mxu1 %v151_v36  ;;  %238 = vmatpush.msra.mxu2 %v104_v37  ;;  %v140_v58 = vld [vmem:[#allocation2 + $0x1b8] sm:$0xff]  ;;  %v133_v60 = vld [vmem:[#allocation2 + $0x180] sm:$0xff]  ;;  %v86_v62 = vld [vmem:[#allocation2 + $0x8] sm:$0xff] }
  0x24   :  { %257 = vmatpush.msra.mxu3 %v155_v38  ;;  %199 = vmatpush.msra.mxu0 %v100_v39  ;;  %v1045_v61 = vld [vmem:[%s1179_s0] sm:$0xff]  ;;  %v132_v63 = vld [vmem:[#allocation2 + $0x178] sm:$0xff]  ;;  %v1050_v1 = vld [vmem:[%s1179_s0 + $0x8] sm:$0xff] }
  0x25   :  { %219 = vmatpush.msra.mxu1 %v148_v40  ;;  %239 = vmatpush.msra.mxu2 %v101_v41  ;;  %v137_v0 = vld [vmem:[#allocation2 + $0x1a0] sm:$0xff]  ;;  %v180_v3 = vld [vmem:[#allocation2 + $0x2f8] sm:$0xff]  ;;  %v134_v4 = vld [vmem:[#allocation2 + $0x188] sm:$0xff] }
  0x26   :  { %258 = vmatpush.msra.mxu3 %v152_v42  ;;  %200 = vmatpush.msra.mxu0 %v97_v43  ;;  %v129_v2 = vld [vmem:[#allocation2 + $0x160] sm:$0xff]  ;;  %v126_v5 = vld [vmem:[#allocation2 + $0x148] sm:$0xff]  ;;  %v354_v8 = vld [vmem:[#allocation5 + $0x150] sm:$0xff] }
  0x27   :  { %220 = vmatpush.msra.mxu1 %v145_v44  ;;  %240 = vmatpush.msra.mxu2 %v98_v45  ;;  %v177_v6 = vld [vmem:[#allocation2 + $0x2e0] sm:$0xff]  ;;  %v357_v7 = vld [vmem:[#allocation5 + $0x168] sm:$0xff]  ;;  %v123_v9 = vld [vmem:[#allocation2 + $0x130] sm:$0xff] }
  0x28   :  { %259 = vmatpush.msra.mxu3 %v149_v46  ;;  %201 = vmatpush.msra.mxu0 %v94_v47  ;;  %v174_v10 = vld [vmem:[#allocation2 + $0x2c8] sm:$0xff]  ;;  %v351_v11 = vld [vmem:[#allocation5 + $0x138] sm:$0xff]  ;;  %v171_v13 = vld [vmem:[#allocation2 + $0x2b0] sm:$0xff] }
  0x29   :  { %221 = vmatpush.msra.mxu1 %v142_v48  ;;  %241 = vmatpush.msra.mxu2 %v95_v49  ;;  %v120_v12 = vld [vmem:[#allocation2 + $0x118] sm:$0xff]  ;;  %v348_v14 = vld [vmem:[#allocation5 + $0x120] sm:$0xff]  ;;  %v345_v17 = vld [vmem:[#allocation5 + $0x108] sm:$0xff] }
  0x2a   :  { %260 = vmatpush.msra.mxu3 %v146_v50  ;;  %202 = vmatpush.msra.mxu0 %v91_v51  ;;  %v117_v15 = vld [vmem:[#allocation2 + $0x100] sm:$0xff]  ;;  %v168_v16 = vld [vmem:[#allocation2 + $0x298] sm:$0xff]  ;;  %v405_v18 = vld [vmem:[#allocation5 + $0x2e8] sm:$0xff] }
  0x2b   :  { %222 = vmatpush.msra.mxu1 %v139_v52  ;;  %242 = vmatpush.msra.mxu2 %v92_v53  ;;  %v114_v19 = vld [vmem:[#allocation2 + $0xe8] sm:$0xff]  ;;  %v402_v20 = vld [vmem:[#allocation5 + $0x2d0] sm:$0xff]  ;;  %v165_v21 = vld [vmem:[#allocation2 + $0x280] sm:$0xff] }
  0x2c   :  { %261 = vmatpush.msra.mxu3 %v143_v54  ;;  %203 = vmatpush.msra.mxu0 %v88_v55  ;;  %v342_v22 = vld [vmem:[#allocation5 + $0xf0] sm:$0xff]  ;;  %v399_v24 = vld [vmem:[#allocation5 + $0x2b8] sm:$0xff]  ;;  %v162_v25 = vld [vmem:[#allocation2 + $0x268] sm:$0xff] }
  0x2d   :  { %223 = vmatpush.msra.mxu1 %v136_v56  ;;  %243 = vmatpush.msra.mxu2 %v89_v57  ;;  %v111_v23 = vld [vmem:[#allocation2 + $0xd0] sm:$0xff]  ;;  %v339_v26 = vld [vmem:[#allocation5 + $0xd8] sm:$0xff]  ;;  %v396_v28 = vld [vmem:[#allocation5 + $0x2a0] sm:$0xff] }
  0x2e   :  { %262 = vmatpush.msra.mxu3 %v140_v58  ;;  %204 = vmatpush.msra.mxu0 %v85_v59  ;;  %v108_v27 = vld [vmem:[#allocation2 + $0xb8] sm:$0xff]  ;;  %v159_v29 = vld [vmem:[#allocation2 + $0x250] sm:$0xff]  ;;  %v336_v30 = vld [vmem:[#allocation5 + $0xc0] sm:$0xff] }
  0x2f   :  { %224 = vmatpush.msra.mxu1 %v133_v60  ;;  %205 = vmatmul.f32.vlgmr.msra.gmra.mxu0 %v1045_v61  ;;  %v105_v31 = vld [vmem:[#allocation2 + $0xa0] sm:$0xff]  ;;  %v393_v32 = vld [vmem:[#allocation5 + $0x288] sm:$0xff]  ;;  %v156_v33 = vld [vmem:[#allocation2 + $0x238] sm:$0xff] }
  0x30   :  { %244 = vmatpush.msra.mxu2 %v86_v62  ;;  %269 = vmatpush.msrb.mxu0 %v132_v63  ;;  %v333_v34 = vld [vmem:[#allocation5 + $0xa8] sm:$0xff]  ;;  %v390_v36 = vld [vmem:[#allocation5 + $0x270] sm:$0xff]  ;;  %v153_v37 = vld [vmem:[#allocation2 + $0x220] sm:$0xff] }
  0x31   :  { %263 = vmatpush.msra.mxu3 %v137_v0  ;;  %225 = vmatmul.f32.vlgmr.msra.gmra.mxu1 %v1050_v1  ;;  %v102_v35 = vld [vmem:[#allocation2 + $0x88] sm:$0xff]  ;;  %v330_v38 = vld [vmem:[#allocation5 + $0x90] sm:$0xff]  ;;  %v387_v40 = vld [vmem:[#allocation5 + $0x258] sm:$0xff] }
  0x32   :  { %245 = vmatmul.f32.vlgmr.msra.gmra.mxu2 %v1045_v61  ;;  %270 = vmatpush.msrb.mxu0 %v129_v2  ;;  %v99_v39 = vld [vmem:[#allocation2 + $0x70] sm:$0xff]  ;;  %v150_v41 = vld [vmem:[#allocation2 + $0x208] sm:$0xff]  ;;  %v327_v42 = vld [vmem:[#allocation5 + $0x78] sm:$0xff] }
  0x33   :  { %289 = vmatpush.msrb.mxu1 %v180_v3  ;;  %264 = vmatpush.msra.mxu3 %v134_v4  ;;  %v96_v43 = vld [vmem:[#allocation2 + $0x58] sm:$0xff]  ;;  %v384_v44 = vld [vmem:[#allocation5 + $0x240] sm:$0xff]  ;;  %v147_v45 = vld [vmem:[#allocation2 + $0x1f0] sm:$0xff] }
  0x34   :  { %464 = vmatpush.msrb.mxu2 %v357_v7  ;;  %265 = vmatmul.f32.vlgmr.msra.gmra.mxu3 %v1050_v1  ;;  %v324_v46 = vld [vmem:[#allocation5 + $0x60] sm:$0xff]  ;;  %v381_v48 = vld [vmem:[#allocation5 + $0x228] sm:$0xff]  ;;  %v144_v49 = vld [vmem:[#allocation2 + $0x1d8] sm:$0xff] }
  0x35   :  { %271 = vmatpush.msrb.mxu0 %v126_v5  ;;  %290 = vmatpush.msrb.mxu1 %v177_v6  ;;  %v93_v47 = vld [vmem:[#allocation2 + $0x40] sm:$0xff]  ;;  %v321_v50 = vld [vmem:[#allocation5 + $0x48] sm:$0xff]  ;;  %v378_v52 = vld [vmem:[#allocation5 + $0x210] sm:$0xff] }
  0x36   :  { %465 = vmatpush.msrb.mxu2 %v354_v8  ;;  %484 = vmatpush.msrb.mxu3 %v405_v18  ;;  %v90_v51 = vld [vmem:[#allocation2 + $0x28] sm:$0xff]  ;;  %v141_v53 = vld [vmem:[#allocation2 + $0x1c0] sm:$0xff]  ;;  %v318_v54 = vld [vmem:[#allocation5 + $0x30] sm:$0xff] }
  0x37   :  { %272 = vmatpush.msrb.mxu0 %v123_v9  ;;  %291 = vmatpush.msrb.mxu1 %v174_v10  ;;  %v87_v55 = vld [vmem:[#allocation2 + $0x10] sm:$0xff]  ;;  %v375_v56 = vld [vmem:[#allocation5 + $0x1f8] sm:$0xff]  ;;  %v138_v57 = vld [vmem:[#allocation2 + $0x1a8] sm:$0xff] }
  0x38   :  { %466 = vmatpush.msrb.mxu2 %v351_v11  ;;  %485 = vmatpush.msrb.mxu3 %v402_v20  ;;  %v315_v58 = vld [vmem:[#allocation5 + $0x18] sm:$0xff]  ;;  %v453_v59 = vld [vmem:[#allocation5 + $0x468] sm:$0xff]  ;;  %v135_v60 = vld [vmem:[#allocation2 + $0x190] sm:$0xff] }
  0x39   :  { %273 = vmatpush.msrb.mxu0 %v120_v12  ;;  %292 = vmatpush.msrb.mxu1 %v171_v13  ;;  %v372_v62 = vld [vmem:[#allocation5 + $0x1e0] sm:$0xff]  ;;  %v358_v0 = vld [vmem:[#allocation5 + $0x170] sm:$0xff]  ;;  %v355_v4 = vld [vmem:[#allocation5 + $0x158] sm:$0xff] }
  0x3a   :  { %467 = vmatpush.msrb.mxu2 %v348_v14  ;;  %486 = vmatpush.msrb.mxu3 %v399_v24  ;;  %v312_v63 = vld [vmem:[#allocation5] sm:$0xff]  ;;  %v406_v2 = vld [vmem:[#allocation5 + $0x2f0] sm:$0xff]  ;;  %v403_v5 = vld [vmem:[#allocation5 + $0x2d8] sm:$0xff] }
  0x3b   :  { %274 = vmatpush.msrb.mxu0 %v117_v15  ;;  %293 = vmatpush.msrb.mxu1 %v168_v16  ;;  %v450_v3 = vld [vmem:[#allocation5 + $0x450] sm:$0xff]  ;;  %v447_v6 = vld [vmem:[#allocation5 + $0x438] sm:$0xff]  ;;  %v352_v7 = vld [vmem:[#allocation5 + $0x140] sm:$0xff] }
  0x3c   :  { %468 = vmatpush.msrb.mxu2 %v345_v17  ;;  %487 = vmatpush.msrb.mxu3 %v396_v28  ;;  %v400_v8 = vld [vmem:[#allocation5 + $0x2c0] sm:$0xff]  ;;  %v349_v9 = vld [vmem:[#allocation5 + $0x128] sm:$0xff]  ;;  %v346_v12 = vld [vmem:[#allocation5 + $0x110] sm:$0xff] }
  0x3d   :  { %275 = vmatpush.msrb.mxu0 %v114_v19  ;;  %294 = vmatpush.msrb.mxu1 %v165_v21  ;;  %v397_v10 = vld [vmem:[#allocation5 + $0x2a8] sm:$0xff]  ;;  %v438_v13 = vld [vmem:[#allocation5 + $0x3f0] sm:$0xff]  ;;  %v343_v14 = vld [vmem:[#allocation5 + $0xf8] sm:$0xff] }
  0x3e   :  { %469 = vmatpush.msrb.mxu2 %v342_v22  ;;  %488 = vmatpush.msrb.mxu3 %v393_v32  ;;  %v441_v11 = vld [vmem:[#allocation5 + $0x408] sm:$0xff]  ;;  %v391_v15 = vld [vmem:[#allocation5 + $0x278] sm:$0xff]  ;;  %v340_v17 = vld [vmem:[#allocation5 + $0xe0] sm:$0xff] }
  0x3f   :  { %276 = vmatpush.msrb.mxu0 %v111_v23  ;;  %295 = vmatpush.msrb.mxu1 %v162_v25  ;;  %v435_v16 = vld [vmem:[#allocation5 + $0x3d8] sm:$0xff]  ;;  %v388_v18 = vld [vmem:[#allocation5 + $0x260] sm:$0xff]  ;;  %v337_v20 = vld [vmem:[#allocation5 + $0xc8] sm:$0xff] }
  0x40   :  { %470 = vmatpush.msrb.mxu2 %v339_v26  ;;  %489 = vmatpush.msrb.mxu3 %v390_v36  ;;  %v432_v19 = vld [vmem:[#allocation5 + $0x3c0] sm:$0xff]  ;;  %v385_v21 = vld [vmem:[#allocation5 + $0x248] sm:$0xff]  ;;  %v334_v22 = vld [vmem:[#allocation5 + $0xb0] sm:$0xff] }
  0x41   :  { %277 = vmatpush.msrb.mxu0 %v108_v27  ;;  %296 = vmatpush.msrb.mxu1 %v159_v29  ;;  %v382_v23 = vld [vmem:[#allocation5 + $0x230] sm:$0xff]  ;;  %v331_v24 = vld [vmem:[#allocation5 + $0x98] sm:$0xff]  ;;  %v328_v26 = vld [vmem:[#allocation5 + $0x80] sm:$0xff] }
  0x42   :  { %471 = vmatpush.msrb.mxu2 %v336_v30  ;;  %490 = vmatpush.msrb.mxu3 %v387_v40  ;;  %v379_v25 = vld [vmem:[#allocation5 + $0x218] sm:$0xff]  ;;  %v376_v27 = vld [vmem:[#allocation5 + $0x200] sm:$0xff]  ;;  %v325_v28 = vld [vmem:[#allocation5 + $0x68] sm:$0xff] }
  0x43   :  { %278 = vmatpush.msrb.mxu0 %v105_v31  ;;  %297 = vmatpush.msrb.mxu1 %v156_v33  ;;  %v373_v29 = vld [vmem:[#allocation5 + $0x1e8] sm:$0xff]  ;;  %v322_v30 = vld [vmem:[#allocation5 + $0x50] sm:$0xff]  ;;  %v319_v31 = vld [vmem:[#allocation5 + $0x38] sm:$0xff] }
  0x44   :  { %472 = vmatpush.msrb.mxu2 %v333_v34  ;;  %491 = vmatpush.msrb.mxu3 %v384_v44  ;;  %v316_v32 = vld [vmem:[#allocation5 + $0x20] sm:$0xff]  ;;  %v369_v33 = vld [vmem:[#allocation5 + $0x1c8] sm:$0xff]  ;;  %v370_v36 = vld [vmem:[#allocation5 + $0x1d0] sm:$0xff] }
  0x45   :  { %279 = vmatpush.msrb.mxu0 %v102_v35  ;;  %298 = vmatpush.msrb.mxu1 %v153_v37  ;;  %v429_v34 = vld [vmem:[#allocation5 + $0x3a8] sm:$0xff]  ;;  %v407_v37 = vld [vmem:[#allocation5 + $0x2f8] sm:$0xff]  ;;  %v364_v44 = vld [vmem:[#allocation5 + $0x1a0] sm:$0xff] }
  0x46   :  { %473 = vmatpush.msrb.mxu2 %v330_v38  ;;  %492 = vmatpush.msrb.mxu3 %v381_v48  ;;  %v313_v35 = vld [vmem:[#allocation5 + $0x8] sm:$0xff]  ;;  %v366_v38 = vld [vmem:[#allocation5 + $0x1b0] sm:$0xff]  ;;  %v367_v40 = vld [vmem:[#allocation5 + $0x1b8] sm:$0xff] }
  0x47   :  { %280 = vmatpush.msrb.mxu0 %v99_v39  ;;  %299 = vmatpush.msrb.mxu1 %v150_v41  ;;  %v426_v39 = vld [vmem:[#allocation5 + $0x390] sm:$0xff]  ;;  %v404_v41 = vld [vmem:[#allocation5 + $0x2e0] sm:$0xff]  ;;  %v361_v48 = vld [vmem:[#allocation5 + $0x188] sm:$0xff] }
  0x48   :  { %474 = vmatpush.msrb.mxu2 %v327_v42  ;;  %493 = vmatpush.msrb.mxu3 %v378_v52  ;;  %v363_v42 = vld [vmem:[#allocation5 + $0x198] sm:$0xff] }
  0x49   :  { %281 = vmatpush.msrb.mxu0 %v96_v43  ;;  %300 = vmatpush.msrb.mxu1 %v147_v45  ;;  %v423_v43 = vld [vmem:[#allocation5 + $0x378] sm:$0xff]  ;;  %v401_v45 = vld [vmem:[#allocation5 + $0x2c8] sm:$0xff] }
  0x4a   :  { %475 = vmatpush.msrb.mxu2 %v324_v46  ;;  %494 = vmatpush.msrb.mxu3 %v375_v56  ;;  %v360_v46 = vld [vmem:[#allocation5 + $0x180] sm:$0xff]  ;;  %v451_v52 = vld [vmem:[#allocation5 + $0x458] sm:$0xff] }
  0x4b   :  { %282 = vmatpush.msrb.mxu0 %v93_v47  ;;  %301 = vmatpush.msrb.mxu1 %v144_v49  ;;  %v420_v47 = vld [vmem:[#allocation5 + $0x360] sm:$0xff]  ;;  %v454_v49 = vld [vmem:[#allocation5 + $0x470] sm:$0xff] }
  0x4c   :  { %476 = vmatpush.msrb.mxu2 %v321_v50  ;;  %495 = vmatpush.msrb.mxu3 %v372_v62  ;;  %v398_v50 = vld [vmem:[#allocation5 + $0x2b0] sm:$0xff]  ;;  %v392_v56 = vld [vmem:[#allocation5 + $0x280] sm:$0xff] }
  0x4d   :  { %283 = vmatpush.msrb.mxu0 %v90_v51  ;;  %302 = vmatpush.msrb.mxu1 %v141_v53  ;;  %v417_v51 = vld [vmem:[#allocation5 + $0x348] sm:$0xff]  ;;  %v395_v53 = vld [vmem:[#allocation5 + $0x298] sm:$0xff]  ;;  %v442_v62 = vld [vmem:[#allocation5 + $0x410] sm:$0xff] }
  0x4e   :  { %477 = vmatpush.msrb.mxu2 %v318_v54  ;;  %496 = vmatpush.msrb.mxu3 %v369_v33  ;;  %v414_v54 = vld [vmem:[#allocation5 + $0x330] sm:$0xff]  ;;  %v329_v33 = vld [vmem:[#allocation5 + $0x88] sm:$0xff] }
  0x4f   :  { %284 = vmatpush.msrb.mxu0 %v87_v55  ;;  %303 = vmatpush.msrb.mxu1 %v138_v57  ;;  %v448_v55 = vld [vmem:[#allocation5 + $0x440] sm:$0xff]  ;;  %v411_v57 = vld [vmem:[#allocation5 + $0x318] sm:$0xff] }
  0x50   :  { %285 = vmatmul.f32.vlgmr.msrb.gmra.mxu0 %v1045_v61  ;;  %478 = vmatpush.msrb.mxu2 %v315_v58  ;;  %v444_v61 = vld [vmem:[#allocation5 + $0x420] sm:$0xff]  ;;  %v445_v58 = vld [vmem:[#allocation5 + $0x428] sm:$0xff] }
  0x51   :  { %504 = vmatpush.msra.mxu0 %v453_v59  ;;  %304 = vmatpush.msrb.mxu1 %v135_v60  ;;  %v389_v59 = vld [vmem:[#allocation5 + $0x268] sm:$0xff]  ;;  %v408_v60 = vld [vmem:[#allocation5 + $0x300] sm:$0xff] }
  0x52   :  { %305 = vmatmul.f32.vlgmr.msrb.gmra.mxu1 %v1050_v1  ;;  %479 = vmatpush.msrb.mxu2 %v312_v63  ;;  %v394_v1 = vld [vmem:[#allocation5 + $0x290] sm:$0xff]  ;;  %v359_v63 = vld [vmem:[#allocation5 + $0x178] sm:$0xff] }
  0x53   :  { %524 = vmatpush.msra.mxu1 %v358_v0  ;;  %505 = vmatpush.msra.mxu0 %v450_v3  ;;  %v386_v0 = vld [vmem:[#allocation5 + $0x250] sm:$0xff]  ;;  %v356_v3 = vld [vmem:[#allocation5 + $0x160] sm:$0xff] }
  0x54   :  { %544 = vmatpush.msra.mxu2 %v406_v2  ;;  %497 = vmatpush.msrb.mxu3 %v366_v38  ;;  %v439_v2 = vld [vmem:[#allocation5 + $0x3f8] sm:$0xff]  ;;  %v326_v38 = vld [vmem:[#allocation5 + $0x70] sm:$0xff] }
  0x55   :  { %525 = vmatpush.msra.mxu1 %v355_v4  ;;  %506 = vmatpush.msra.mxu0 %v447_v6  ;;  %v383_v4 = vld [vmem:[#allocation5 + $0x238] sm:$0xff]  ;;  %v353_v6 = vld [vmem:[#allocation5 + $0x148] sm:$0xff] }
  0x56   :  { %545 = vmatpush.msra.mxu2 %v403_v5  ;;  %498 = vmatpush.msrb.mxu3 %v363_v42  ;;  %v436_v5 = vld [vmem:[#allocation5 + $0x3e0] sm:$0xff]  ;;  %v449_v42 = vld [vmem:[#allocation5 + $0x448] sm:$0xff] }
  0x57   :  { %526 = vmatpush.msra.mxu1 %v352_v7  ;;  %507 = vmatpush.msra.mxu0 %v444_v61  ;;  %v380_v7 = vld [vmem:[#allocation5 + $0x220] sm:$0xff]  ;;  %v350_v61 = vld [vmem:[#allocation5 + $0x130] sm:$0xff] }
  0x58   :  { %546 = vmatpush.msra.mxu2 %v400_v8  ;;  %499 = vmatpush.msrb.mxu3 %v360_v46  ;;  %v433_v8 = vld [vmem:[#allocation5 + $0x3c8] sm:$0xff]  ;;  %v446_v46 = vld [vmem:[#allocation5 + $0x430] sm:$0xff] }
  0x59   :  { %527 = vmatpush.msra.mxu1 %v349_v9  ;;  %508 = vmatpush.msra.mxu0 %v441_v11  ;;  %v377_v9 = vld [vmem:[#allocation5 + $0x208] sm:$0xff]  ;;  %v347_v11 = vld [vmem:[#allocation5 + $0x118] sm:$0xff] }
  0x5a   :  { %547 = vmatpush.msra.mxu2 %v397_v10  ;;  %564 = vmatpush.msra.mxu3 %v454_v49  ;;  %v430_v10 = vld [vmem:[#allocation5 + $0x3b0] sm:$0xff] }
  0x5b   :  { %528 = vmatpush.msra.mxu1 %v346_v12  ;;  %509 = vmatpush.msra.mxu0 %v438_v13  ;;  %v374_v12 = vld [vmem:[#allocation5 + $0x1f0] sm:$0xff]  ;;  %v344_v13 = vld [vmem:[#allocation5 + $0x100] sm:$0xff] }
  0x5c   :  { %548 = vmatpush.msra.mxu2 %v394_v1  ;;  %565 = vmatpush.msra.mxu3 %v451_v52  ;;  %v427_v1 = vld [vmem:[#allocation5 + $0x398] sm:$0xff]  ;;  %v440_v52 = vld [vmem:[#allocation5 + $0x400] sm:$0xff] }
  0x5d   :  { %529 = vmatpush.msra.mxu1 %v343_v14  ;;  %510 = vmatpush.msra.mxu0 %v435_v16  ;;  %v1061_v14 = vld [vmem:[%s1181_s2] sm:$0x7] }
  0x5e   :  { %549 = vmatpush.msra.mxu2 %v391_v15  ;;  %566 = vmatpush.msra.mxu3 %v448_v55  ;;  %v371_v15 = vld [vmem:[#allocation5 + $0x1d8] sm:$0xff]  ;;  %v424_v16 = vld [vmem:[#allocation5 + $0x380] sm:$0xff]  ;;  %v434_v55 = vld [vmem:[#allocation5 + $0x3d0] sm:$0xff] }
  0x5f   :  { %530 = vmatpush.msra.mxu1 %v340_v17  ;;  %511 = vmatpush.msra.mxu0 %v432_v19  ;;  %v341_v17 = vld [vmem:[#allocation5 + $0xe8] sm:$0xff]  ;;  %v183_v19 = vperm.slane %v1061_v14, 0 }
  0x60   :  { %550 = vmatpush.msra.mxu2 %v388_v18  ;;  %567 = vmatpush.msra.mxu3 %v445_v58  ;;  %v368_v18 = vld [vmem:[#allocation5 + $0x1c0] sm:$0xff]  ;;  %v425_v58 = vld [vmem:[#allocation5 + $0x388] sm:$0xff] }
  0x61   :  { %531 = vmatpush.msra.mxu1 %v337_v20  ;;  %512 = vmatpush.msra.mxu0 %v429_v34  ;;  %v421_v20 = vld [vmem:[#allocation5 + $0x368] sm:$0xff] }
  0x62   :  { %551 = vmatpush.msra.mxu2 %v385_v21  ;;  %568 = vmatpush.msra.mxu3 %v442_v62  ;;  %v338_v21 = vld [vmem:[#allocation5 + $0xd0] sm:$0xff]  ;;  %v419_v62 = vld [vmem:[#allocation5 + $0x358] sm:$0xff] }
  0x63   :  { %532 = vmatpush.msra.mxu1 %v334_v22  ;;  %513 = vmatpush.msra.mxu0 %v426_v39  ;;  %v365_v22 = vld [vmem:[#allocation5 + $0x1a8] sm:$0xff]  ;;  %v452_v39 = vld [vmem:[#allocation5 + $0x460] sm:$0xff] }
  0x64   :  { %552 = vmatpush.msra.mxu2 %v382_v23  ;;  %569 = vmatpush.msra.mxu3 %v439_v2 }
  0x65   :  { %533 = vmatpush.msra.mxu1 %v331_v24  ;;  %514 = vmatpush.msra.mxu0 %v423_v43  ;;  %v418_v24 = vld [vmem:[#allocation5 + $0x350] sm:$0xff]  ;;  %v323_v43 = vld [vmem:[#allocation5 + $0x58] sm:$0xff] }
  0x66   :  { %553 = vmatpush.msra.mxu2 %v379_v25  ;;  %570 = vmatpush.msra.mxu3 %v436_v5  ;;  %v335_v25 = vld [vmem:[#allocation5 + $0xb8] sm:$0xff] }
  0x67   :  { %534 = vmatpush.msra.mxu1 %v328_v26  ;;  %515 = vmatpush.msra.mxu0 %v420_v47  ;;  %v362_v26 = vld [vmem:[#allocation5 + $0x190] sm:$0xff] }
  0x68   :  { %554 = vmatpush.msra.mxu2 %v376_v27  ;;  %571 = vmatpush.msra.mxu3 %v433_v8  ;;  %v661_v8 = vld [vmem:[#allocation7 + $0x70] sm:$0xff] }
  0x69   :  { %535 = vmatpush.msra.mxu1 %v325_v28  ;;  %516 = vmatpush.msra.mxu0 %v417_v51  ;;  %v314_v51 = vld [vmem:[#allocation5 + $0x10] sm:$0xff] }
  0x6a   :  { %555 = vmatpush.msra.mxu2 %v373_v29  ;;  %572 = vmatpush.msra.mxu3 %v430_v10  ;;  %v415_v29 = vld [vmem:[#allocation5 + $0x338] sm:$0xff]  ;;  %v677_v10 = vld [vmem:[#allocation7 + $0xf0] sm:$0xff] }
  0x6b   :  { %536 = vmatpush.msra.mxu1 %v322_v30  ;;  %517 = vmatpush.msra.mxu0 %v414_v54  ;;  %v332_v30 = vld [vmem:[#allocation5 + $0xa0] sm:$0xff]  ;;  %v437_v54 = vld [vmem:[#allocation5 + $0x3e8] sm:$0xff] }
  0x6c   :  { %556 = vmatpush.msra.mxu2 %v370_v36  ;;  %573 = vmatpush.msra.mxu3 %v427_v1  ;;  %v184_v36 = vperm.slane %v1061_v14, 1  ;;  %v657_v1 = vld [vmem:[#allocation7 + $0x50] sm:$0xff] }
  0x6d   :  { %537 = vmatpush.msra.mxu1 %v319_v31  ;;  %518 = vmatpush.msra.mxu0 %v411_v57  ;;  %v428_v57 = vld [vmem:[#allocation5 + $0x3a0] sm:$0xff] }
  0x6e   :  { %557 = vmatpush.msra.mxu2 %v367_v40  ;;  %574 = vmatpush.msra.mxu3 %v424_v16  ;;  %v694_v16 = vld [vmem:[#allocation7 + $0x178] sm:$0xff] }
  0x6f   :  { %538 = vmatpush.msra.mxu1 %v316_v32  ;;  %519 = vmatpush.msra.mxu0 %v408_v60  ;;  %v412_v32 = vld [vmem:[#allocation5 + $0x320] sm:$0xff]  ;;  %v185_v60 = vperm.slane %v1061_v14, 2  ;;  %v656_v14 = vld [vmem:[#allocation7 + $0x48] sm:$0xff] }
  0x70   :  { %558 = vmatpush.msra.mxu2 %v364_v44  ;;  %575 = vmatpush.msra.mxu3 %v421_v20  ;;  %v320_v44 = vld [vmem:[#allocation5 + $0x40] sm:$0xff]  ;;  %v692_v20 = vld [vmem:[#allocation7 + $0x168] sm:$0xff] }
  0x71   :  { %539 = vmatpush.msra.mxu1 %v313_v35  ;;  %584 = vmatpush.msrb.mxu0 %v359_v63  ;;  %v455_v35 = vld [vmem:[#allocation5 + $0x478] sm:$0xff] }
  0x72   :  { %559 = vmatpush.msra.mxu2 %v361_v48  ;;  %576 = vmatpush.msra.mxu3 %v418_v24  ;;  %v317_v48 = vld [vmem:[#allocation5 + $0x28] sm:$0xff]  ;;  %v653_v24 = vld [vmem:[#allocation7 + $0x30] sm:$0xff] }
  0x73   :  { %604 = vmatpush.msrb.mxu1 %v407_v37  ;;  %585 = vmatpush.msrb.mxu0 %v356_v3  ;;  %v409_v37 = vld [vmem:[#allocation5 + $0x308] sm:$0xff] }
  0x74   :  { %577 = vmatpush.msra.mxu3 %v415_v29  ;;  %v413_v3 = vld [vmem:[#allocation5 + $0x328] sm:$0xff]  ;;  %v689_v29 = vld [vmem:[#allocation7 + $0x150] sm:$0xff] }
  0x75   :  { %605 = vmatpush.msrb.mxu1 %v404_v41  ;;  %586 = vmatpush.msrb.mxu0 %v353_v6  ;;  %v410_v6 = vld [vmem:[#allocation5 + $0x310] sm:$0xff] }
  0x76   :  { %578 = vmatpush.msra.mxu3 %v412_v32  ;;  %v688_v32 = vld [vmem:[#allocation7 + $0x148] sm:$0xff] }
  0x77   :  { %606 = vmatpush.msrb.mxu1 %v401_v45  ;;  %587 = vmatpush.msrb.mxu0 %v350_v61  ;;  %v660_v61 = vld [vmem:[#allocation7 + $0x68] sm:$0xff] }
  0x78   :  { %579 = vmatpush.msra.mxu3 %v409_v37  ;;  %v687_v37 = vld [vmem:[#allocation7 + $0x140] sm:$0xff] }
  0x79   :  { %607 = vmatpush.msrb.mxu1 %v398_v50  ;;  %588 = vmatpush.msrb.mxu0 %v347_v11  ;;  %v443_v50 = vld [vmem:[#allocation5 + $0x418] sm:$0xff]  ;;  %v659_v11 = vld [vmem:[#allocation7 + $0x60] sm:$0xff] }
  0x7b   :  { %608 = vmatpush.msrb.mxu1 %v395_v53  ;;  %589 = vmatpush.msrb.mxu0 %v344_v13  ;;  %v662_v53 = vld [vmem:[#allocation7 + $0x78] sm:$0xff]  ;;  %v676_v13 = vld [vmem:[#allocation7 + $0xe8] sm:$0xff] }
  0x7d   :  { %609 = vmatpush.msrb.mxu1 %v392_v56  ;;  %590 = vmatpush.msrb.mxu0 %v341_v17  ;;  %v431_v56 = vld [vmem:[#allocation5 + $0x3b8] sm:$0xff]  ;;  %v655_v17 = vld [vmem:[#allocation7 + $0x40] sm:$0xff] }
  0x7f   :  { %610 = vmatpush.msrb.mxu1 %v389_v59  ;;  %591 = vmatpush.msrb.mxu0 %v338_v21  ;;  %v422_v59 = vld [vmem:[#allocation5 + $0x370] sm:$0xff]  ;;  %v654_v21 = vld [vmem:[#allocation7 + $0x38] sm:$0xff] }
  0x81   :  { %611 = vmatpush.msrb.mxu1 %v386_v0  ;;  %592 = vmatpush.msrb.mxu0 %v335_v25  ;;  %v416_v0 = vld [vmem:[#allocation5 + $0x340] sm:$0xff]  ;;  %v672_v25 = vld [vmem:[#allocation7 + $0xc8] sm:$0xff] }
  0x83   :  { %612 = vmatpush.msrb.mxu1 %v383_v4  ;;  %593 = vmatpush.msrb.mxu0 %v332_v30  ;;  %v651_v30 = vld [vmem:[#allocation7 + $0x20] sm:$0xff] }
  0x85   :  { %613 = vmatpush.msrb.mxu1 %v380_v7  ;;  %594 = vmatpush.msrb.mxu0 %v329_v33  ;;  %v650_v33 = vld [vmem:[#allocation7 + $0x18] sm:$0xff] }
  0x87   :  { %614 = vmatpush.msrb.mxu1 %v377_v9  ;;  %595 = vmatpush.msrb.mxu0 %v326_v38  ;;  %v678_v9 = vld [vmem:[#allocation7 + $0xf8] sm:$0xff]  ;;  %v648_v38 = vld [vmem:[#allocation7 + $0x8] sm:$0xff] }
  0x89   :  { %615 = vmatpush.msrb.mxu1 %v374_v12  ;;  %596 = vmatpush.msrb.mxu0 %v323_v43  ;;  %v658_v12 = vld [vmem:[#allocation7 + $0x58] sm:$0xff]  ;;  %v685_v43 = vld [vmem:[#allocation7 + $0x130] sm:$0xff] }
  0x8b   :  { %616 = vmatpush.msrb.mxu1 %v371_v15  ;;  %597 = vmatpush.msrb.mxu0 %v320_v44  ;;  %v675_v15 = vld [vmem:[#allocation7 + $0xe0] sm:$0xff]  ;;  %v665_v44 = vld [vmem:[#allocation7 + $0x90] sm:$0xff] }
  0x8d   :  { %617 = vmatpush.msrb.mxu1 %v368_v18  ;;  %598 = vmatpush.msrb.mxu0 %v317_v48  ;;  %v674_v18 = vld [vmem:[#allocation7 + $0xd8] sm:$0xff]  ;;  %v663_v48 = vld [vmem:[#allocation7 + $0x80] sm:$0xff] }
  0x8f   :  { %618 = vmatpush.msrb.mxu1 %v365_v22  ;;  %599 = vmatpush.msrb.mxu0 %v314_v51  ;;  %v673_v22 = vld [vmem:[#allocation7 + $0xd0] sm:$0xff]  ;;  %v680_v51 = vld [vmem:[#allocation7 + $0x108] sm:$0xff] }
  0x91   :  { %619 = vmatpush.msrb.mxu1 %v362_v26  ;;  %v690_v26 = vld [vmem:[#allocation7 + $0x158] sm:$0xff] }
  0xac   :  { %v206_v23 = vpop.f32.mrf.mxu0 }
  0xad   :  { %v207_v27 = vadd.f32 %v206_v23, %v183_v19  ;;  %v693_v19 = vld [vmem:[#allocation7 + $0x170] sm:$0xff]  ;;  %v691_v23 = vld [vmem:[#allocation7 + $0x160] sm:$0xff] }
  0xae   :  { %v226_v28 = vpop.f32.mrf.mxu1 }
  0xaf   :  { %v227_v31 = vadd.f32 %v226_v28, %v207_v27  ;;  %v652_v27 = vld [vmem:[#allocation7 + $0x28] sm:$0xff]  ;;  %v671_v28 = vld [vmem:[#allocation7 + $0xc0] sm:$0xff] }
  0xb1   :  { %v1064_v34 = vmax.f32 %v227_v31, 0.0  ;;  %v670_v31 = vld [vmem:[#allocation7 + $0xb8] sm:$0xff] }
  0xb3   :  { %480 = vmatmul.f32.vlgmr.msrb.gmra.mxu2 %v1064_v34  ;;  %540 = vmatmul.f32.vlgmr.msra.gmra.mxu1 %v1064_v34 }
  0xb4   :  { %624 = vmatpush.msrb.mxu2 %v455_v35  ;;  %739 = vmatpush.msra.mxu1 %v694_v16  ;;  %v649_v35 = vld [vmem:[#allocation7 + $0x10] sm:$0xff] }
  0xb5   :  { %v246_v40 = vpop.f32.mrf.mxu2 }
  0xb6   :  { %v247_v41 = vadd.f32 %v246_v40, %v184_v36  ;;  %625 = vmatpush.msrb.mxu2 %v452_v39  ;;  %740 = vmatpush.msra.mxu1 %v693_v19  ;;  %v668_v36 = vld [vmem:[#allocation7 + $0xa8] sm:$0xff]  ;;  %v667_v39 = vld [vmem:[#allocation7 + $0xa0] sm:$0xff]  ;;  %v686_v40 = vld [vmem:[#allocation7 + $0x138] sm:$0xff] }
  0xb7   :  { %v266_v45 = vpop.f32.mrf.mxu3 }
  0xb8   :  { %v267_v47 = vadd.f32 %v266_v45, %v247_v41  ;;  %626 = vmatpush.msrb.mxu2 %v449_v42  ;;  %741 = vmatpush.msra.mxu1 %v692_v20  ;;  %v647_v41 = vld [vmem:[#allocation7] sm:$0xff]  ;;  %v666_v42 = vld [vmem:[#allocation7 + $0x98] sm:$0xff]  ;;  %v684_v45 = vld [vmem:[#allocation7 + $0x128] sm:$0xff] }
  0xba   :  { %v310_v49 = vmax.f32 %v267_v47, 0.0  ;;  %627 = vmatpush.msrb.mxu2 %v446_v46  ;;  %742 = vmatpush.msra.mxu1 %v691_v23  ;;  %v664_v46 = vld [vmem:[#allocation7 + $0x88] sm:$0xff]  ;;  %v683_v47 = vld [vmem:[#allocation7 + $0x120] sm:$0xff] }
  0xbc   :  { %500 = vmatmul.f32.vlgmr.msrb.gmra.mxu3 %v310_v49  ;;  %560 = vmatmul.f32.vlgmr.msra.gmra.mxu2 %v310_v49 }
  0xbd   :  { %628 = vmatpush.msrb.mxu2 %v443_v50  ;;  %620 = vmatmul.f32.vlgmr.msrb.gmra.mxu1 %v310_v49  ;;  %v682_v49 = vld [vmem:[#allocation7 + $0x118] sm:$0xff]  ;;  %v681_v50 = vld [vmem:[#allocation7 + $0x110] sm:$0xff] }
  0xbe   :  { %699 = vmatpush.msrb.mxu3 %v662_v53  ;;  %743 = vmatpush.msra.mxu1 %v690_v26  ;;  %v774_v53 = vld [vmem:[%s1186_s7 + $0x78] sm:$0xff] }
  0xbf   :  { %629 = vmatpush.msrb.mxu2 %v440_v52  ;;  %v679_v52 = vld [vmem:[#allocation7 + $0x100] sm:$0xff]  ;;  %v762_v26 = vld [vmem:[%s1186_s7 + $0x18] sm:$0xff] }
  0xc0   :  { %700 = vmatpush.msrb.mxu3 %v661_v8  ;;  %744 = vmatpush.msra.mxu1 %v689_v29  ;;  %v759_v29 = vld [vmem:[%s1186_s7] sm:$0xff] }
  0xc1   :  { %630 = vmatpush.msrb.mxu2 %v437_v54  ;;  %v773_v54 = vld [vmem:[%s1186_s7 + $0x70] sm:$0xff] }
  0xc2   :  { %701 = vmatpush.msrb.mxu3 %v660_v61  ;;  %745 = vmatpush.msra.mxu1 %v688_v32  ;;  %v816_v32 = vld [vmem:[%s1188_s9 + $0x68] sm:$0xff] }
  0xc3   :  { %631 = vmatpush.msrb.mxu2 %v434_v55  ;;  %v772_v55 = vld [vmem:[%s1186_s7 + $0x68] sm:$0xff] }
  0xc4   :  { %702 = vmatpush.msrb.mxu3 %v659_v11  ;;  %746 = vmatpush.msra.mxu1 %v687_v37  ;;  %v811_v37 = vld [vmem:[%s1188_s9 + $0x40] sm:$0xff] }
  0xc5   :  { %632 = vmatpush.msrb.mxu2 %v431_v56  ;;  %v771_v56 = vld [vmem:[%s1186_s7 + $0x60] sm:$0xff] }
  0xc6   :  { %703 = vmatpush.msrb.mxu3 %v658_v12  ;;  %747 = vmatpush.msra.mxu1 %v686_v40 }
  0xc7   :  { %633 = vmatpush.msrb.mxu2 %v428_v57  ;;  %v456_v57 = vld [vmem:[%s1183_s4] sm:$0x7] }
  0xc8   :  { %704 = vmatpush.msrb.mxu3 %v657_v1  ;;  %748 = vmatpush.msra.mxu1 %v685_v43  ;;  %v764_v1 = vld [vmem:[%s1186_s7 + $0x28] sm:$0xff] }
  0xc9   :  { %634 = vmatpush.msrb.mxu2 %v425_v58  ;;  %v458_v58 = vperm.slane %v456_v57, 0 }
  0xca   :  { %705 = vmatpush.msrb.mxu3 %v656_v14  ;;  %749 = vmatpush.msra.mxu1 %v684_v45  ;;  %v460_v14 = vperm.slane %v456_v57, 2  ;;  %v810_v45 = vld [vmem:[%s1188_s9 + $0x38] sm:$0xff] }
  0xcb   :  { %635 = vmatpush.msrb.mxu2 %v422_v59  ;;  %v770_v59 = vld [vmem:[%s1186_s7 + $0x58] sm:$0xff] }
  0xcc   :  { %706 = vmatpush.msrb.mxu3 %v655_v17  ;;  %750 = vmatpush.msra.mxu1 %v683_v47  ;;  %v808_v47 = vld [vmem:[%s1188_s9 + $0x28] sm:$0xff] }
  0xcd   :  { %v286_v63 = vpop.f32.mrf.mxu0  ;;  %636 = vmatpush.msrb.mxu2 %v419_v62  ;;  %v769_v62 = vld [vmem:[%s1186_s7 + $0x50] sm:$0xff] }
  0xce   :  { %v287_v2 = vadd.f32 %v286_v63, %v185_v60  ;;  %707 = vmatpush.msrb.mxu3 %v654_v21  ;;  %751 = vmatpush.msra.mxu1 %v682_v49  ;;  %v806_v49 = vld [vmem:[%s1188_s9 + $0x18] sm:$0xff] }
  0xcf   :  { %v306_v4 = vpop.f32.mrf.mxu1  ;;  %637 = vmatpush.msrb.mxu2 %v416_v0  ;;  %v768_v0 = vld [vmem:[%s1186_s7 + $0x48] sm:$0xff] }
  0xd0   :  { %v307_v5 = vadd.f32 %v306_v4, %v287_v2  ;;  %708 = vmatpush.msrb.mxu3 %v653_v24  ;;  %752 = vmatpush.msra.mxu1 %v681_v50  ;;  %v459_v4 = vperm.slane %v456_v57, 1  ;;  %v805_v50 = vld [vmem:[%s1188_s9 + $0x10] sm:$0xff] }
  0xd1   :  { %638 = vmatpush.msrb.mxu2 %v413_v3  ;;  %v767_v3 = vld [vmem:[%s1186_s7 + $0x40] sm:$0xff] }
  0xd2   :  { %v311_v7 = vmax.f32 %v307_v5, 0.0  ;;  %709 = vmatpush.msrb.mxu3 %v652_v27  ;;  %753 = vmatpush.msra.mxu1 %v680_v51  ;;  %v761_v27 = vld [vmem:[%s1186_s7 + $0x10] sm:$0xff]  ;;  %v804_v51 = vld [vmem:[%s1188_s9 + $0x8] sm:$0xff] }
  0xd3   :  { %639 = vmatpush.msrb.mxu2 %v410_v6  ;;  %v766_v6 = vld [vmem:[%s1186_s7 + $0x38] sm:$0xff] }
  0xd4   :  { %520 = vmatmul.f32.vlgmr.msra.gmra.mxu0 %v311_v7  ;;  %580 = vmatmul.f32.vlgmr.msra.gmra.mxu3 %v311_v7 }
  0xd5   :  { %640 = vmatmul.f32.vlgmr.msrb.gmra.mxu2 %v311_v7  ;;  %719 = vmatpush.msra.mxu0 %v678_v9  ;;  %v765_v9 = vld [vmem:[%s1186_s7 + $0x30] sm:$0xff] }
  0xd6   :  { %710 = vmatpush.msrb.mxu3 %v651_v30  ;;  %754 = vmatpush.msra.mxu1 %v679_v52  ;;  %v818_v30 = vld [vmem:[%s1188_s9 + $0x78] sm:$0xff]  ;;  %v803_v52 = vld [vmem:[%s1188_s9] sm:$0xff] }
  0xd7   :  { %720 = vmatpush.msra.mxu0 %v677_v10  ;;  %775 = vmatpush.msra.mxu2 %v774_v53  ;;  %v795_v53 = vld [vmem:[%s1187_s8] sm:$0xff] }
  0xd8   :  { %711 = vmatpush.msrb.mxu3 %v650_v33  ;;  %v815_v33 = vld [vmem:[%s1188_s9 + $0x60] sm:$0xff] }
  0xd9   :  { %721 = vmatpush.msra.mxu0 %v676_v13  ;;  %776 = vmatpush.msra.mxu2 %v773_v54 }
  0xda   :  { %712 = vmatpush.msrb.mxu3 %v649_v35  ;;  %v813_v35 = vld [vmem:[%s1188_s9 + $0x50] sm:$0xff] }
  0xdb   :  { %722 = vmatpush.msra.mxu0 %v675_v15  ;;  %777 = vmatpush.msra.mxu2 %v772_v55 }
  0xdc   :  { %600 = vmatmul.f32.vlgmr.msrb.gmra.mxu0 %v1064_v34  ;;  %v669_v34 = vld [vmem:[#allocation7 + $0xb0] sm:$0xff]  ;;  %713 = vmatpush.msrb.mxu3 %v648_v38  ;;  %v867_v38 = vld [vmem:[%s1185_s6] ss:$0 sm:$0xff] }
  0xdd   :  { %723 = vmatpush.msra.mxu0 %v674_v18  ;;  %778 = vmatpush.msra.mxu2 %v771_v56 }
  0xde   :  { %714 = vmatpush.msrb.mxu3 %v647_v41 }
  0xdf   :  { %724 = vmatpush.msra.mxu0 %v673_v22  ;;  %779 = vmatpush.msra.mxu2 %v770_v59 }
  0xe0   :  { %819 = vmatpush.msra.mxu3 %v818_v30 }
  0xe1   :  { %725 = vmatpush.msra.mxu0 %v672_v25  ;;  %780 = vmatpush.msra.mxu2 %v769_v62  ;;  %v763_v25 = vld [vmem:[%s1186_s7 + $0x20] sm:$0xff] }
  0xe3   :  { %726 = vmatpush.msra.mxu0 %v671_v28  ;;  %781 = vmatpush.msra.mxu2 %v768_v0  ;;  %v760_v28 = vld [vmem:[%s1186_s7 + $0x8] sm:$0xff]  ;;  %s977_s7 = smov [#allocation8]  }
  0xe4   :  { %s846_s4 = sshll.u32 %s977_s7, 4  ;;  %s847_s4 = int_to_ptr.vmem [resolvable:$true] %s846_s4 }
  0xe5   :  { %727 = vmatpush.msra.mxu0 %v670_v31  ;;  %782 = vmatpush.msra.mxu2 %v767_v3  ;;  %v817_v31 = vld [vmem:[%s1188_s9 + $0x70] sm:$0xff] }
  0xe6   :  { %820 = vmatpush.msra.mxu3 %v817_v31 }
  0xe7   :  { %728 = vmatpush.msra.mxu0 %v669_v34  ;;  %783 = vmatpush.msra.mxu2 %v766_v6  ;;  %v814_v34 = vld [vmem:[%s1188_s9 + $0x58] sm:$0xff] }
  0xe8   :  { %821 = vmatpush.msra.mxu3 %v816_v32 }
  0xe9   :  { %729 = vmatpush.msra.mxu0 %v668_v36  ;;  %784 = vmatpush.msra.mxu2 %v765_v9  ;;  %v812_v36 = vld [vmem:[%s1188_s9 + $0x48] sm:$0xff] }
  0xea   :  { %822 = vmatpush.msra.mxu3 %v815_v33 }
  0xeb   :  { %730 = vmatpush.msra.mxu0 %v667_v39  ;;  %785 = vmatpush.msra.mxu2 %v764_v1 }
  0xec   :  { %823 = vmatpush.msra.mxu3 %v814_v34 }
  0xed   :  { %731 = vmatpush.msra.mxu0 %v666_v42  ;;  %786 = vmatpush.msra.mxu2 %v763_v25 }
  0xee   :  { %824 = vmatpush.msra.mxu3 %v813_v35 }
  0xef   :  { %732 = vmatpush.msra.mxu0 %v665_v44  ;;  %787 = vmatpush.msra.mxu2 %v762_v26 }
  0xf0   :  { %825 = vmatpush.msra.mxu3 %v812_v36 }
  0xf1   :  { %733 = vmatpush.msra.mxu0 %v664_v46  ;;  %788 = vmatpush.msra.mxu2 %v761_v27  ;;  %v809_v46 = vld [vmem:[%s1188_s9 + $0x30] sm:$0xff] }
  0xf2   :  { %826 = vmatpush.msra.mxu3 %v811_v37 }
  0xf3   :  { %734 = vmatpush.msra.mxu0 %v663_v48  ;;  %789 = vmatpush.msra.mxu2 %v760_v28  ;;  %v807_v48 = vld [vmem:[%s1188_s9 + $0x20] sm:$0xff]  ;;  %s848_s9 = sshll.u32 %s1189_s10, 4  ;;  %s849_s9 = int_to_ptr.hbm [resolvable:$true] %s848_s9 }
  0xf4   :  { %827 = vmatpush.msra.mxu3 %v810_v45 }
  0xf5   :  { %790 = vmatpush.msra.mxu2 %v759_v29 }
  0xf6   :  { %828 = vmatpush.msra.mxu3 %v809_v46 }
  0xf8   :  { %829 = vmatpush.msra.mxu3 %v808_v47 }
  0xfa   :  { %830 = vmatpush.msra.mxu3 %v807_v48 }
  0xfc   :  { %831 = vmatpush.msra.mxu3 %v806_v49 }
  0xfe   :  { %832 = vmatpush.msra.mxu3 %v805_v50 }
 0x100   :  { %833 = vmatpush.msra.mxu3 %v804_v51 }
 0x102   :  { %834 = vmatpush.msra.mxu3 %v803_v52 }
 0x130   :  { %v541_v7 = vpop.f32.mrf.mxu1 }
 0x131   :  { %v542_v11 = vadd.f32 %v541_v7, %v459_v4 }
 0x136   :  { %v481_v60 = vpop.f32.mrf.mxu2 }
 0x137   :  { %v482_v63 = vadd.f32 %v481_v60, %v458_v58 }
 0x13a   :  { %v621_v20 = vpop.f32.mrf.mxu1 }
 0x13f   :  { %v501_v2 = vpop.f32.mrf.mxu3  ;;  %v561_v10 = vpop.f32.mrf.mxu2 }
 0x140   :  { %v502_v5 = vadd.f32 %v501_v2, %v482_v63  ;;  %v562_v13 = vadd.f32 %v561_v10, %v542_v11 }
 0x151   :  { %v521_v8 = vpop.f32.mrf.mxu0 }
 0x152   :  { %v522_v61 = vadd.f32 %v521_v8, %v502_v5 }
 0x154   :  { %v644_v12 = vmax.f32 %v522_v61, 0.0 }
 0x156   :  { %715 = vmatmul.f32.vlgmr.msrb.gmra.mxu3 %v644_v12 }
 0x157   :  { %v581_v15 = vpop.f32.mrf.mxu3 }
 0x158   :  { %v582_v16 = vadd.f32 %v581_v15, %v562_v13  ;;  %v641_v22 = vpop.f32.mrf.mxu2 }
 0x159   :  { %v601_v17 = vpop.f32.mrf.mxu0 }
 0x15a   :  { %v645_v18 = vmax.f32 %v582_v16, 0.0  ;;  %v602_v19 = vadd.f32 %v601_v17, %v460_v14 }
 0x15c   :  { %v622_v21 = vadd.f32 %v621_v20, %v602_v19  ;;  %735 = vmatmul.f32.vlgmr.msra.gmra.mxu0 %v645_v18 }
 0x15e   :  { %v642_v23 = vadd.f32 %v641_v22, %v622_v21 }
 0x160   :  { %v646_v24 = vmax.f32 %v642_v23, 0.0 }
 0x162   :  { %755 = vmatmul.f32.vlgmr.msra.gmra.mxu1 %v646_v24 }
 0x1d9   :  { %v716_v39 = vpop.f32.mrf.mxu3  ;;  %v736_v41 = vpop.f32.mrf.mxu0 }
 0x1da   :  { %v717_v40 = vadd.f32 %v867_v38, %v716_v39 }
 0x1dc   :  { %v737_v42 = vadd.f32 %v736_v41, %v717_v40 }
 0x1df   :  { %v756_v43 = vpop.f32.mrf.mxu1 }
 0x1e0   :  { %v757_v44 = vadd.f32 %v756_v43, %v737_v42 }
 0x1e2   :  { %791 = vmatmul.f32.vlgmr.msra.gmra.mxu2 %v757_v44 }
 0x265   :  { %v792_v54 = vpop.f32.mrf.mxu2 }
 0x266   :  { %v796_v55 = vmul.f32 %v795_v53, %v792_v54 }
 0x268   :  { %v797_v56 = vrot.slane %v796_v55, 4 }
 0x26a   :  { %v798_v57 = vadd.f32 %v797_v56, %v796_v55 }
 0x26c   :  { %v799_v58 = vrot.slane %v798_v57, 2 }
 0x26e   :  { %v800_v59 = vadd.f32 %v799_v58, %v798_v57 }
 0x270   :  { %v801_v60 = vrot.slane %v800_v59, 1 }
 0x272   :  { %v802_v62 = vadd.f32 %v801_v60, %v800_v59 }
 0x274   :  { %835 = vmatmul.f32.vlgmr.msra.gmra.mxu3 %v802_v62 }
 0x2f7   :  { %v836_v63 = vpop.f32.mrf.mxu3 }
 0x2f8   :  { %840 = vst.msk [vmem:[#allocation8] sm:$0x1] %vm839_vm0, %v836_v63 }
 0x2f9   :  { %851 = dma.vmem_to_hbm [thread:$0]  %s847_s4, 16, %s849_s9, [#allocation4]  }
 0x2fa   :  { %968 = dma.done.wait [#allocation4], 16  }
 0x2fb   :  { %969 = vsyncadd [#allocation4], 4294967280 }
 0x2fc   :  { %856 = vsyncpa [#allocation3], 1 }
 0x2fd   :  { %857 = vsyncpa [#allocation6], 1 }
 0x2fe   :  { %858 = vsyncpa [#allocation4], 1 }

</bundles_post_ra>
